<compile_context>
chip_gen: v7x
topology: tpu7x:2x2x1
jax: 0.10.0
libtpu: 0.0.40
codegen_flags: <defaults>
</compile_context>

<pallas_src>
import functools

import jax
import jax.numpy as jnp
from jax.experimental import pallas as pl
from jax.experimental.pallas import tpu as pltpu

LEAKY_SLOPE = 0.01           # nn.LeakyReLU(0.01) in the reference Conv block
BN_EPS = 1e-5
ACT_DTYPE = jnp.bfloat16     # inter-layer activation dtype
VMEM_LIMIT = 48 * 1024 * 1024


def _round_up(x, m):
    return (x + m - 1) // m * m


# ----------------------------------------------------------------------------
# 3x3 conv (implicit GEMM) + folded BN bias + LeakyReLU
# ----------------------------------------------------------------------------
def _conv3_kernel(x0_ref, x1_ref, x2_ref, w_ref, b_ref, o_ref, *,
                  n_img, w_out, cin):
    # x{dh}_ref : (n_img, W+2, cin)  bf16   row h+dh of the zero-padded input
    # w_ref     : (3, 3*cin, tn)     bf16   BN-scale-folded weights
    # b_ref     : (1, tn)            f32    folded BN bias
    # o_ref     : (n_img, W, tn)     bf16
    w = w_ref[...]
    bias = b_ref[...]
    xs = (x0_ref[...], x1_ref[...], x2_ref[...])
    # Batch is small and unrolled in-kernel so every dot stays 2-D on the MXU.
    for b in range(n_img):
        acc = None
        for dh in range(3):
            xrow = xs[dh][b]                             # (W+2, cin)
            for dw in range(3):
                part = jnp.dot(xrow[dw:dw + w_out, :],
                               w[dh, dw * cin:(dw + 1) * cin, :],
                               preferred_element_type=jnp.float32)
                acc = part if acc is None else acc + part
        y = acc + bias
        o_ref[b] = jnp.maximum(y, LEAKY_SLOPE * y).astype(o_ref.dtype)


def conv3_bn_lrelu(x, w3, bias, *, cout):
    """x: (N,H,W,Cin) NHWC bf16; 3x3 conv, stride 1, pad 1, fused BN+LeakyReLU."""
    n, h, w, cin = x.shape
    cin_p = w3.shape[1] // 3
    n_pad = w3.shape[2]
    tn = min(512, n_pad)                 # tn=512 on 1024-wide layers -> nj=2
    nj = n_pad // tn

    # Single pad: channel pad (stem only, 3 -> 8) + spatial halo.
    xp = jnp.pad(x, ((0, 0), (1, 1), (1, 1), (0, cin_p - cin)))

    kernel = functools.partial(_conv3_kernel, n_img=n, w_out=w, cin=cin_p)
    flops = 2 * n * h * w * 9 * cin_p * n_pad
    bytes_accessed = 3 * xp.size * 2 + w3.size * 2 + n * h * w * n_pad * 2 \
        + bias.size * 4

    out = pl.pallas_call(
        kernel,
        out_shape=jax.ShapeDtypeStruct((n, h, w, n_pad), ACT_DTYPE),
        grid_spec=pltpu.PrefetchScalarGridSpec(
            num_scalar_prefetch=0,
            grid=(nj, h),                 # j outer: weight tile resident over rows
            in_specs=[
                pl.BlockSpec((n, None, w + 2, cin_p),
                             lambda j, r, dh=dh: (0, r + dh, 0, 0))
                for dh in range(3)
            ] + [
                pl.BlockSpec((3, 3 * cin_p, tn), lambda j, r: (0, 0, j)),
                pl.BlockSpec((1, tn), lambda j, r: (0, j)),
            ],
            out_specs=pl.BlockSpec((n, None, w, tn), lambda j, r: (0, r, 0, j)),
        ),
        compiler_params=pltpu.CompilerParams(
            dimension_semantics=("parallel", "parallel"),
            vmem_limit_bytes=VMEM_LIMIT),
        cost_estimate=pl.CostEstimate(flops=flops, transcendentals=0,
                                      bytes_accessed=bytes_accessed),
    )(xp, xp, xp, w3, bias)
    if n_pad != cout:
        out = out[..., :cout]
    return out


# ----------------------------------------------------------------------------
# 1x1 conv: single-shot GEMM (full K in one block) + bias + LeakyReLU
# ----------------------------------------------------------------------------
def _mm_bias_lrelu_kernel(x_ref, w_ref, b_ref, o_ref):
    y = jnp.dot(x_ref[...], w_ref[...], preferred_element_type=jnp.float32)
    y = y + b_ref[...]
    o_ref[...] = jnp.maximum(y, LEAKY_SLOPE * y).astype(o_ref.dtype)


def _gemm_tiles(m, n_pad):
    if m >= 512:
        tm = 512
    elif m >= 256:
        tm = 256
    else:
        tm = _round_up(max(m, 1), 16)    # bf16 packs 16 rows per sublane tile
    tn = 512 if n_pad >= 512 else n_pad
    mi = _round_up(m, tm) // tm
    if mi * (n_pad // tn) < 2 and n_pad >= 256:
        tn = n_pad // 2                  # keep >=2 parallel iterations (v7x)
    return tm, tn


def conv1_bn_lrelu(x, w_mat, bias, *, cout):
    """x: (N,H,W,Cin) bf16; 1x1 conv as a flattened GEMM with fused epilogue."""
    n, h, w, cin = x.shape
    m = n * h * w
    k, n_pad = w_mat.shape
    tm, tn = _gemm_tiles(m, n_pad)
    m_pad = _round_up(m, tm)

    xm = x.reshape(m, cin)
    if m_pad != m:
        xm = jnp.pad(xm, ((0, m_pad - m), (0, 0)))

    flops = 2 * m_pad * n_pad * k
    bytes_accessed = (m_pad * k + k * n_pad + m_pad * n_pad) * 2 + n_pad * 4

    out = pl.pallas_call(
        _mm_bias_lrelu_kernel,
        out_shape=jax.ShapeDtypeStruct((m_pad, n_pad), ACT_DTYPE),
        grid_spec=pltpu.PrefetchScalarGridSpec(
            num_scalar_prefetch=0,
            grid=(m_pad // tm, n_pad // tn),
            in_specs=[
                pl.BlockSpec((tm, k), lambda i, j: (i, 0)),
                pl.BlockSpec((k, tn), lambda i, j: (0, j)),
                pl.BlockSpec((1, tn), lambda i, j: (0, j)),
            ],
            out_specs=pl.BlockSpec((tm, tn), lambda i, j: (i, j)),
        ),
        compiler_params=pltpu.CompilerParams(
            dimension_semantics=("parallel", "parallel"),
            vmem_limit_bytes=VMEM_LIMIT),
        cost_estimate=pl.CostEstimate(flops=flops, transcendentals=0,
                                      bytes_accessed=bytes_accessed),
    )(xm, w_mat, bias)
    return out[:m, :cout].reshape(n, h, w, cout)


# ----------------------------------------------------------------------------
# MaxPool2d(2, 2): dense (rt, 2, W, C) blocks; horizontal max via strided ds
# ----------------------------------------------------------------------------
def _maxpool_kernel(x_ref, o_ref, *, wo):
    a = x_ref[:, :, pl.ds(0, wo, stride=2), :]       # even columns
    b = x_ref[:, :, pl.ds(1, wo, stride=2), :]       # odd columns
    o_ref[...] = jnp.max(jnp.maximum(a, b), axis=1)  # vertical window


def maxpool2x2(x):
    n, h, w, c = x.shape
    ho, wo = h // 2, w // 2
    rows = n * ho
    xr = x.reshape(rows, 2, w, c)                    # pure reshape, no transpose
    rt = min(128, rows)
    rows_pad = _round_up(rows, rt)
    if rows_pad != rows:
        xr = jnp.pad(xr, ((0, rows_pad - rows), (0, 0), (0, 0), (0, 0)))
    out = pl.pallas_call(
        functools.partial(_maxpool_kernel, wo=wo),
        out_shape=jax.ShapeDtypeStruct((rows_pad, wo, c), x.dtype),
        grid_spec=pltpu.PrefetchScalarGridSpec(
            num_scalar_prefetch=0,
            grid=(rows_pad // rt,),
            in_specs=[pl.BlockSpec((rt, 2, w, c), lambda i: (i, 0, 0, 0))],
            out_specs=pl.BlockSpec((rt, wo, c), lambda i: (i, 0, 0)),
        ),
        compiler_params=pltpu.CompilerParams(
            dimension_semantics=("parallel",),
            vmem_limit_bytes=VMEM_LIMIT),
    )(xr)
    return out[:rows].reshape(n, ho, wo, c)


# ----------------------------------------------------------------------------
# Global average pool (mean over H, W) with a resident f32 accumulator
# ----------------------------------------------------------------------------
def _gap_kernel(x_ref, o_ref, *, inv_hw):
    i = pl.program_id(0)

    @pl.when(i == 0)
    def _():
        o_ref[...] = jnp.zeros_like(o_ref)

    o_ref[...] += jnp.sum(x_ref[...].astype(jnp.float32), axis=1)

    @pl.when(i == pl.num_programs(0) - 1)
    def _():
        o_ref[...] *= inv_hw


def global_avg_pool(x):
    n, h, w, c = x.shape
    hw = h * w
    x3 = x.reshape(n, hw, c)
    thw = 256 if hw >= 256 else _round_up(hw, 8)
    hw_pad = _round_up(hw, thw)
    c_pad = _round_up(c, 128)
    if hw_pad != hw or c_pad != c:
        x3 = jnp.pad(x3, ((0, 0), (0, hw_pad - hw), (0, c_pad - c)))
    out = pl.pallas_call(
        functools.partial(_gap_kernel, inv_hw=1.0 / hw),
        out_shape=jax.ShapeDtypeStruct((n, c_pad), jnp.float32),
        grid_spec=pltpu.PrefetchScalarGridSpec(
            num_scalar_prefetch=0,
            grid=(hw_pad // thw,),
            in_specs=[pl.BlockSpec((n, thw, c_pad), lambda i: (0, i, 0))],
            out_specs=pl.BlockSpec((n, c_pad), lambda i: (0, 0)),
        ),
        compiler_params=pltpu.CompilerParams(
            dimension_semantics=("arbitrary",),
            vmem_limit_bytes=VMEM_LIMIT),
    )(x3)
    return out[:, :c]


# ----------------------------------------------------------------------------
# DarkNet19 definition (channel widths from the PyTorch module)
# ----------------------------------------------------------------------------
DARKNET19_LAYERS = [
    ("conv", 3, 32, 3), ("pool",), ("conv", 32, 64, 3), ("pool",),
    ("conv", 64, 128, 3), ("conv", 128, 64, 1), ("conv", 64, 128, 3), ("pool",),
    ("conv", 128, 256, 3), ("conv", 256, 128, 1), ("conv", 128, 256, 3), ("pool",),
    ("conv", 256, 512, 3), ("conv", 512, 256, 1), ("conv", 256, 512, 3),
    ("conv", 512, 256, 1), ("conv", 256, 512, 3), ("pool",),
    ("conv", 512, 1024, 3), ("conv", 1024, 512, 1), ("conv", 512, 1024, 3),
    ("conv", 1024, 512, 1), ("conv", 512, 1024, 3),
]


def init_params(key, num_classes):
    """Returns (arrays, cfg): arrays = pytree of device arrays, cfg = static
    per-layer metadata (layer kind + true output channels)."""
    layer_specs = DARKNET19_LAYERS + [("conv", 1024, num_classes, 1)]
    arrays, cfg = [], []
    for spec in layer_specs:
        if spec[0] == "pool":
            arrays.append(None)
            cfg.append(("pool",))
            continue
        _, c1, c2, k = spec
        key, sub = jax.random.split(key)
        fan_in = c1 * k * k
        std = (2.0 / fan_in) ** 0.5                      # kaiming-normal, fan_in
        wgt = std * jax.random.normal(sub, (c2, c1, k, k), jnp.float32)

        # Fresh-init BN fold: gamma=1, beta=0, mean=0, var=1
        #   -> scale = 1/sqrt(1+eps) folded into the weights, bias = 0.
        scale = jnp.full((c2,), 1.0 / (1.0 + BN_EPS) ** 0.5, jnp.float32)
        n_pad = _round_up(c2, 128)
        bias = jnp.zeros((1, n_pad), jnp.float32)

        if k == 3:
            cin_p = _round_up(c1, 8)
            w = jnp.transpose(wgt, (2, 3, 1, 0)) * scale          # (3,3,c1,c2)
            w = jnp.pad(w, ((0, 0), (0, 0), (0, cin_p - c1), (0, n_pad - c2)))
            w = w.reshape(3, 3 * cin_p, n_pad).astype(jnp.bfloat16)
            arrays.append((w, bias))
            cfg.append(("conv3", c2))
        else:
            w = wgt[:, :, 0, 0].T * scale                          # (c1, c2)
            w = jnp.pad(w, ((0, 0), (0, n_pad - c2))).astype(jnp.bfloat16)
            arrays.append((w, bias))
            cfg.append(("conv1", c2))
    return arrays, tuple(cfg)


def darknet19_forward(x_nchw, arrays, *, cfg):
    x = jnp.transpose(x_nchw, (0, 2, 3, 1)).astype(ACT_DTYPE)   # NCHW -> NHWC bf16
    for spec, p in zip(cfg, arrays):
        if spec[0] == "pool":
            x = maxpool2x2(x)
        elif spec[0] == "conv3":
            w3, bias = p
            x = conv3_bn_lrelu(x, w3, bias, cout=spec[1])
        else:
            w1, bias = p
            x = conv1_bn_lrelu(x, w1, bias, cout=spec[1])
    return global_avg_pool(x)            # (N, num_classes) f32


def _conv3_self_check():
    """Tiny numerical probe of the implicit-GEMM conv kernel (silent)."""
    k1, k2 = jax.random.split(jax.random.PRNGKey(1))
    xt = jax.random.normal(k1, (2, 8, 8, 16), jnp.float32).astype(ACT_DTYPE)
    wt = (0.1 * jax.random.normal(k2, (3, 48, 128), jnp.float32)).astype(jnp.bfloat16)
    bt = jnp.zeros((1, 128), jnp.float32)
    got = conv3_bn_lrelu(xt, wt, bt, cout=128).astype(jnp.float32)
    xpad = jnp.pad(xt.astype(jnp.float32), ((0, 0), (1, 1), (1, 1), (0, 0)))
    acc = jnp.zeros((2, 8, 8, 128), jnp.float32)
    for dh in range(3):
        for dw in range(3):
            acc += jnp.einsum("nhwc,co->nhwo",
                              xpad[:, dh:dh + 8, dw:dw + 8, :],
                              wt[dh, dw * 16:(dw + 1) * 16, :].astype(jnp.float32))
    ref = jnp.maximum(acc, LEAKY_SLOPE * acc)
    assert jnp.allclose(got, ref, atol=1e-1, rtol=5e-2)


if __name__ == "__main__":
    num_classes = 16            # small head (module default is 1000)
    key = jax.random.PRNGKey(0)
    kx, kp = jax.random.split(key)

    # NCHW input like PyTorch; 32x32 is the smallest spatial size surviving
    # the five 2x2 max-pools.  (Note: at this toy size the GEMMs are tiny and
    # per-call overhead dominates; the tiling is chosen for realistic sizes.)
    x = jax.random.normal(kx, (2, 3, 32, 32), jnp.float32)
    arrays, cfg = init_params(kp, num_classes)

    _conv3_self_check()

    fwd = jax.jit(functools.partial(darknet19_forward, cfg=cfg))
    out = fwd(x, arrays)
    jax.block_until_ready(out)
    assert out.shape == (2, num_classes), out.shape
    assert jnp.all(jnp.isfinite(out))
    print("KERNEL_OK")
</pallas_src>

<mosaic_0001>
module attributes {stable_mosaic.version = 11 : i64} {
  func.func @_conv3_kernel(%arg0: i32, %arg1: i32, %arg2: memref<2x1x10x16xbf16, #tpu.memory_space<vmem>>, %arg3: memref<2x1x10x16xbf16, #tpu.memory_space<vmem>>, %arg4: memref<2x1x10x16xbf16, #tpu.memory_space<vmem>>, %arg5: memref<3x48x128xbf16, #tpu.memory_space<vmem>>, %arg6: memref<1x128xf32, #tpu.memory_space<vmem>>, %arg7: memref<2x1x8x128xbf16, #tpu.memory_space<vmem>>) attributes {dimension_semantics = [#tpu.dimension_semantics<parallel>, #tpu.dimension_semantics<parallel>], iteration_bounds = array<i64: 1, 8>, scalar_prefetch = 0 : i64, scratch_operands = 0 : i64, tpu.core_type = #tpu.core_type<tc>, window_params = [{transform_indices = @transform_0, window_bounds = array<i64: 2, 1, 10, 16>}, {transform_indices = @transform_1, window_bounds = array<i64: 2, 1, 10, 16>}, {transform_indices = @transform_2, window_bounds = array<i64: 2, 1, 10, 16>}, {transform_indices = @transform_3, window_bounds = array<i64: 3, 48, 128>}, {transform_indices = @transform_4, window_bounds = array<i64: 1, 128>}, {transform_indices = @transform_5, window_bounds = array<i64: 2, 1, 8, 128>}]} {
    %c0 = arith.constant 0 : index
    %c0_0 = arith.constant 0 : index
    %c0_1 = arith.constant 0 : index
    %0 = vector.load %arg5[%c0, %c0_0, %c0_1] : memref<3x48x128xbf16, #tpu.memory_space<vmem>>, vector<3x48x128xbf16>
    %c0_2 = arith.constant 0 : index
    %c0_3 = arith.constant 0 : index
    %1 = vector.load %arg6[%c0_2, %c0_3] : memref<1x128xf32, #tpu.memory_space<vmem>>, vector<1x128xf32>
    %c0_4 = arith.constant 0 : index
    %c0_5 = arith.constant 0 : index
    %c0_6 = arith.constant 0 : index
    %c0_7 = arith.constant 0 : index
    %2 = vector.load %arg2[%c0_4, %c0_5, %c0_6, %c0_7] : memref<2x1x10x16xbf16, #tpu.memory_space<vmem>>, vector<2x1x10x16xbf16>
    %3 = vector.shape_cast %2 : vector<2x1x10x16xbf16> to vector<2x10x16xbf16>
    %c0_8 = arith.constant 0 : index
    %c0_9 = arith.constant 0 : index
    %c0_10 = arith.constant 0 : index
    %c0_11 = arith.constant 0 : index
    %4 = vector.load %arg3[%c0_8, %c0_9, %c0_10, %c0_11] : memref<2x1x10x16xbf16, #tpu.memory_space<vmem>>, vector<2x1x10x16xbf16>
    %5 = vector.shape_cast %4 : vector<2x1x10x16xbf16> to vector<2x10x16xbf16>
    %c0_12 = arith.constant 0 : index
    %c0_13 = arith.constant 0 : index
    %c0_14 = arith.constant 0 : index
    %c0_15 = arith.constant 0 : index
    %6 = vector.load %arg4[%c0_12, %c0_13, %c0_14, %c0_15] : memref<2x1x10x16xbf16, #tpu.memory_space<vmem>>, vector<2x1x10x16xbf16>
    %7 = vector.shape_cast %6 : vector<2x1x10x16xbf16> to vector<2x10x16xbf16>
    %8 = vector.extract_strided_slice %3 {offsets = [0, 0, 0], sizes = [1, 10, 16], strides = [1, 1, 1]} : vector<2x10x16xbf16> to vector<1x10x16xbf16>
    %9 = vector.shape_cast %8 : vector<1x10x16xbf16> to vector<10x16xbf16>
    %10 = vector.extract_strided_slice %9 {offsets = [0, 0], sizes = [8, 16], strides = [1, 1]} : vector<10x16xbf16> to vector<8x16xbf16>
    %11 = vector.extract_strided_slice %0 {offsets = [0, 0, 0], sizes = [1, 16, 128], strides = [1, 1, 1]} : vector<3x48x128xbf16> to vector<1x16x128xbf16>
    %12 = vector.shape_cast %11 : vector<1x16x128xbf16> to vector<16x128xbf16>
    %cst = arith.constant dense<0.000000e+00> : vector<8x128xf32>
    %13 = tpu.matmul %10, %12, %cst {dimension_numbers = #tpu.dot_dimension_numbers<[1], [0], [0], [1], [0, 0, 1, 1], [], []>} : vector<8x16xbf16>, vector<16x128xbf16>, vector<8x128xf32> -> vector<8x128xf32>
    %14 = vector.extract_strided_slice %9 {offsets = [1, 0], sizes = [8, 16], strides = [1, 1]} : vector<10x16xbf16> to vector<8x16xbf16>
    %15 = vector.extract_strided_slice %0 {offsets = [0, 16, 0], sizes = [1, 16, 128], strides = [1, 1, 1]} : vector<3x48x128xbf16> to vector<1x16x128xbf16>
    %16 = vector.shape_cast %15 : vector<1x16x128xbf16> to vector<16x128xbf16>
    %cst_16 = arith.constant dense<0.000000e+00> : vector<8x128xf32>
    %17 = tpu.matmul %14, %16, %cst_16 {dimension_numbers = #tpu.dot_dimension_numbers<[1], [0], [0], [1], [0, 0, 1, 1], [], []>} : vector<8x16xbf16>, vector<16x128xbf16>, vector<8x128xf32> -> vector<8x128xf32>
    %18 = arith.addf %13, %17 : vector<8x128xf32>
    %19 = vector.extract_strided_slice %9 {offsets = [2, 0], sizes = [8, 16], strides = [1, 1]} : vector<10x16xbf16> to vector<8x16xbf16>
    %20 = vector.extract_strided_slice %0 {offsets = [0, 32, 0], sizes = [1, 16, 128], strides = [1, 1, 1]} : vector<3x48x128xbf16> to vector<1x16x128xbf16>
    %21 = vector.shape_cast %20 : vector<1x16x128xbf16> to vector<16x128xbf16>
    %cst_17 = arith.constant dense<0.000000e+00> : vector<8x128xf32>
    %22 = tpu.matmul %19, %21, %cst_17 {dimension_numbers = #tpu.dot_dimension_numbers<[1], [0], [0], [1], [0, 0, 1, 1], [], []>} : vector<8x16xbf16>, vector<16x128xbf16>, vector<8x128xf32> -> vector<8x128xf32>
    %23 = arith.addf %18, %22 : vector<8x128xf32>
    %24 = vector.extract_strided_slice %5 {offsets = [0, 0, 0], sizes = [1, 10, 16], strides = [1, 1, 1]} : vector<2x10x16xbf16> to vector<1x10x16xbf16>
    %25 = vector.shape_cast %24 : vector<1x10x16xbf16> to vector<10x16xbf16>
    %26 = vector.extract_strided_slice %25 {offsets = [0, 0], sizes = [8, 16], strides = [1, 1]} : vector<10x16xbf16> to vector<8x16xbf16>
    %27 = vector.extract_strided_slice %0 {offsets = [1, 0, 0], sizes = [1, 16, 128], strides = [1, 1, 1]} : vector<3x48x128xbf16> to vector<1x16x128xbf16>
    %28 = vector.shape_cast %27 : vector<1x16x128xbf16> to vector<16x128xbf16>
    %cst_18 = arith.constant dense<0.000000e+00> : vector<8x128xf32>
    %29 = tpu.matmul %26, %28, %cst_18 {dimension_numbers = #tpu.dot_dimension_numbers<[1], [0], [0], [1], [0, 0, 1, 1], [], []>} : vector<8x16xbf16>, vector<16x128xbf16>, vector<8x128xf32> -> vector<8x128xf32>
    %30 = arith.addf %23, %29 : vector<8x128xf32>
    %31 = vector.extract_strided_slice %25 {offsets = [1, 0], sizes = [8, 16], strides = [1, 1]} : vector<10x16xbf16> to vector<8x16xbf16>
    %32 = vector.extract_strided_slice %0 {offsets = [1, 16, 0], sizes = [1, 16, 128], strides = [1, 1, 1]} : vector<3x48x128xbf16> to vector<1x16x128xbf16>
    %33 = vector.shape_cast %32 : vector<1x16x128xbf16> to vector<16x128xbf16>
    %cst_19 = arith.constant dense<0.000000e+00> : vector<8x128xf32>
    %34 = tpu.matmul %31, %33, %cst_19 {dimension_numbers = #tpu.dot_dimension_numbers<[1], [0], [0], [1], [0, 0, 1, 1], [], []>} : vector<8x16xbf16>, vector<16x128xbf16>, vector<8x128xf32> -> vector<8x128xf32>
    %35 = arith.addf %30, %34 : vector<8x128xf32>
    %36 = vector.extract_strided_slice %25 {offsets = [2, 0], sizes = [8, 16], strides = [1, 1]} : vector<10x16xbf16> to vector<8x16xbf16>
    %37 = vector.extract_strided_slice %0 {offsets = [1, 32, 0], sizes = [1, 16, 128], strides = [1, 1, 1]} : vector<3x48x128xbf16> to vector<1x16x128xbf16>
    %38 = vector.shape_cast %37 : vector<1x16x128xbf16> to vector<16x128xbf16>
    %cst_20 = arith.constant dense<0.000000e+00> : vector<8x128xf32>
    %39 = tpu.matmul %36, %38, %cst_20 {dimension_numbers = #tpu.dot_dimension_numbers<[1], [0], [0], [1], [0, 0, 1, 1], [], []>} : vector<8x16xbf16>, vector<16x128xbf16>, vector<8x128xf32> -> vector<8x128xf32>
    %40 = arith.addf %35, %39 : vector<8x128xf32>
    %41 = vector.extract_strided_slice %7 {offsets = [0, 0, 0], sizes = [1, 10, 16], strides = [1, 1, 1]} : vector<2x10x16xbf16> to vector<1x10x16xbf16>
    %42 = vector.shape_cast %41 : vector<1x10x16xbf16> to vector<10x16xbf16>
    %43 = vector.extract_strided_slice %42 {offsets = [0, 0], sizes = [8, 16], strides = [1, 1]} : vector<10x16xbf16> to vector<8x16xbf16>
    %44 = vector.extract_strided_slice %0 {offsets = [2, 0, 0], sizes = [1, 16, 128], strides = [1, 1, 1]} : vector<3x48x128xbf16> to vector<1x16x128xbf16>
    %45 = vector.shape_cast %44 : vector<1x16x128xbf16> to vector<16x128xbf16>
    %cst_21 = arith.constant dense<0.000000e+00> : vector<8x128xf32>
    %46 = tpu.matmul %43, %45, %cst_21 {dimension_numbers = #tpu.dot_dimension_numbers<[1], [0], [0], [1], [0, 0, 1, 1], [], []>} : vector<8x16xbf16>, vector<16x128xbf16>, vector<8x128xf32> -> vector<8x128xf32>
    %47 = arith.addf %40, %46 : vector<8x128xf32>
    %48 = vector.extract_strided_slice %42 {offsets = [1, 0], sizes = [8, 16], strides = [1, 1]} : vector<10x16xbf16> to vector<8x16xbf16>
    %49 = vector.extract_strided_slice %0 {offsets = [2, 16, 0], sizes = [1, 16, 128], strides = [1, 1, 1]} : vector<3x48x128xbf16> to vector<1x16x128xbf16>
    %50 = vector.shape_cast %49 : vector<1x16x128xbf16> to vector<16x128xbf16>
    %cst_22 = arith.constant dense<0.000000e+00> : vector<8x128xf32>
    %51 = tpu.matmul %48, %50, %cst_22 {dimension_numbers = #tpu.dot_dimension_numbers<[1], [0], [0], [1], [0, 0, 1, 1], [], []>} : vector<8x16xbf16>, vector<16x128xbf16>, vector<8x128xf32> -> vector<8x128xf32>
    %52 = arith.addf %47, %51 : vector<8x128xf32>
    %53 = vector.extract_strided_slice %42 {offsets = [2, 0], sizes = [8, 16], strides = [1, 1]} : vector<10x16xbf16> to vector<8x16xbf16>
    %54 = vector.extract_strided_slice %0 {offsets = [2, 32, 0], sizes = [1, 16, 128], strides = [1, 1, 1]} : vector<3x48x128xbf16> to vector<1x16x128xbf16>
    %55 = vector.shape_cast %54 : vector<1x16x128xbf16> to vector<16x128xbf16>
    %cst_23 = arith.constant dense<0.000000e+00> : vector<8x128xf32>
    %56 = tpu.matmul %53, %55, %cst_23 {dimension_numbers = #tpu.dot_dimension_numbers<[1], [0], [0], [1], [0, 0, 1, 1], [], []>} : vector<8x16xbf16>, vector<16x128xbf16>, vector<8x128xf32> -> vector<8x128xf32>
    %57 = arith.addf %52, %56 : vector<8x128xf32>
    %58 = vector.broadcast %1 : vector<1x128xf32> to vector<8x128xf32>
    %59 = arith.addf %57, %58 : vector<8x128xf32>
    %cst_24 = arith.constant 0.00999999977 : f32
    %60 = vector.broadcast %cst_24 : f32 to vector<8x128xf32>
    %61 = arith.mulf %60, %59 : vector<8x128xf32>
    %62 = arith.maximumf %59, %61 : vector<8x128xf32>
    %63 = arith.truncf %62 : vector<8x128xf32> to vector<8x128xbf16>
    %c0_25 = arith.constant 0 : index
    %c0_26 = arith.constant 0 : index
    %c0_27 = arith.constant 0 : index
    %c0_28 = arith.constant 0 : index
    %64 = vector.load %arg7[%c0_25, %c0_26, %c0_27, %c0_28] : memref<2x1x8x128xbf16, #tpu.memory_space<vmem>>, vector<1x1x8x128xbf16>
    %65 = vector.shape_cast %64 : vector<1x1x8x128xbf16> to vector<8x128xbf16>
    %66 = vector.shape_cast %63 : vector<8x128xbf16> to vector<1x1x8x128xbf16>
    tpu.vector_store %arg7[%c0_25, %c0_26, %c0_27, %c0_28], %66 {strides = array<i32>} : memref<2x1x8x128xbf16, #tpu.memory_space<vmem>>, vector<1x1x8x128xbf16>,
    %67 = vector.extract_strided_slice %3 {offsets = [1, 0, 0], sizes = [1, 10, 16], strides = [1, 1, 1]} : vector<2x10x16xbf16> to vector<1x10x16xbf16>
    %68 = vector.shape_cast %67 : vector<1x10x16xbf16> to vector<10x16xbf16>
    %69 = vector.extract_strided_slice %68 {offsets = [0, 0], sizes = [8, 16], strides = [1, 1]} : vector<10x16xbf16> to vector<8x16xbf16>
    %70 = vector.extract_strided_slice %0 {offsets = [0, 0, 0], sizes = [1, 16, 128], strides = [1, 1, 1]} : vector<3x48x128xbf16> to vector<1x16x128xbf16>
    %71 = vector.shape_cast %70 : vector<1x16x128xbf16> to vector<16x128xbf16>
    %cst_29 = arith.constant dense<0.000000e+00> : vector<8x128xf32>
    %72 = tpu.matmul %69, %71, %cst_29 {dimension_numbers = #tpu.dot_dimension_numbers<[1], [0], [0], [1], [0, 0, 1, 1], [], []>} : vector<8x16xbf16>, vector<16x128xbf16>, vector<8x128xf32> -> vector<8x128xf32>
    %73 = vector.extract_strided_slice %68 {offsets = [1, 0], sizes = [8, 16], strides = [1, 1]} : vector<10x16xbf16> to vector<8x16xbf16>
    %74 = vector.extract_strided_slice %0 {offsets = [0, 16, 0], sizes = [1, 16, 128], strides = [1, 1, 1]} : vector<3x48x128xbf16> to vector<1x16x128xbf16>
    %75 = vector.shape_cast %74 : vector<1x16x128xbf16> to vector<16x128xbf16>
    %cst_30 = arith.constant dense<0.000000e+00> : vector<8x128xf32>
    %76 = tpu.matmul %73, %75, %cst_30 {dimension_numbers = #tpu.dot_dimension_numbers<[1], [0], [0], [1], [0, 0, 1, 1], [], []>} : vector<8x16xbf16>, vector<16x128xbf16>, vector<8x128xf32> -> vector<8x128xf32>
    %77 = arith.addf %72, %76 : vector<8x128xf32>
    %78 = vector.extract_strided_slice %68 {offsets = [2, 0], sizes = [8, 16], strides = [1, 1]} : vector<10x16xbf16> to vector<8x16xbf16>
    %79 = vector.extract_strided_slice %0 {offsets = [0, 32, 0], sizes = [1, 16, 128], strides = [1, 1, 1]} : vector<3x48x128xbf16> to vector<1x16x128xbf16>
    %80 = vector.shape_cast %79 : vector<1x16x128xbf16> to vector<16x128xbf16>
    %cst_31 = arith.constant dense<0.000000e+00> : vector<8x128xf32>
    %81 = tpu.matmul %78, %80, %cst_31 {dimension_numbers = #tpu.dot_dimension_numbers<[1], [0], [0], [1], [0, 0, 1, 1], [], []>} : vector<8x16xbf16>, vector<16x128xbf16>, vector<8x128xf32> -> vector<8x128xf32>
    %82 = arith.addf %77, %81 : vector<8x128xf32>
    %83 = vector.extract_strided_slice %5 {offsets = [1, 0, 0], sizes = [1, 10, 16], strides = [1, 1, 1]} : vector<2x10x16xbf16> to vector<1x10x16xbf16>
    %84 = vector.shape_cast %83 : vector<1x10x16xbf16> to vector<10x16xbf16>
    %85 = vector.extract_strided_slice %84 {offsets = [0, 0], sizes = [8, 16], strides = [1, 1]} : vector<10x16xbf16> to vector<8x16xbf16>
    %86 = vector.extract_strided_slice %0 {offsets = [1, 0, 0], sizes = [1, 16, 128], strides = [1, 1, 1]} : vector<3x48x128xbf16> to vector<1x16x128xbf16>
    %87 = vector.shape_cast %86 : vector<1x16x128xbf16> to vector<16x128xbf16>
    %cst_32 = arith.constant dense<0.000000e+00> : vector<8x128xf32>
    %88 = tpu.matmul %85, %87, %cst_32 {dimension_numbers = #tpu.dot_dimension_numbers<[1], [0], [0], [1], [0, 0, 1, 1], [], []>} : vector<8x16xbf16>, vector<16x128xbf16>, vector<8x128xf32> -> vector<8x128xf32>
    %89 = arith.addf %82, %88 : vector<8x128xf32>
    %90 = vector.extract_strided_slice %84 {offsets = [1, 0], sizes = [8, 16], strides = [1, 1]} : vector<10x16xbf16> to vector<8x16xbf16>
    %91 = vector.extract_strided_slice %0 {offsets = [1, 16, 0], sizes = [1, 16, 128], strides = [1, 1, 1]} : vector<3x48x128xbf16> to vector<1x16x128xbf16>
    %92 = vector.shape_cast %91 : vector<1x16x128xbf16> to vector<16x128xbf16>
    %cst_33 = arith.constant dense<0.000000e+00> : vector<8x128xf32>
    %93 = tpu.matmul %90, %92, %cst_33 {dimension_numbers = #tpu.dot_dimension_numbers<[1], [0], [0], [1], [0, 0, 1, 1], [], []>} : vector<8x16xbf16>, vector<16x128xbf16>, vector<8x128xf32> -> vector<8x128xf32>
    %94 = arith.addf %89, %93 : vector<8x128xf32>
    %95 = vector.extract_strided_slice %84 {offsets = [2, 0], sizes = [8, 16], strides = [1, 1]} : vector<10x16xbf16> to vector<8x16xbf16>
    %96 = vector.extract_strided_slice %0 {offsets = [1, 32, 0], sizes = [1, 16, 128], strides = [1, 1, 1]} : vector<3x48x128xbf16> to vector<1x16x128xbf16>
    %97 = vector.shape_cast %96 : vector<1x16x128xbf16> to vector<16x128xbf16>
    %cst_34 = arith.constant dense<0.000000e+00> : vector<8x128xf32>
    %98 = tpu.matmul %95, %97, %cst_34 {dimension_numbers = #tpu.dot_dimension_numbers<[1], [0], [0], [1], [0, 0, 1, 1], [], []>} : vector<8x16xbf16>, vector<16x128xbf16>, vector<8x128xf32> -> vector<8x128xf32>
    %99 = arith.addf %94, %98 : vector<8x128xf32>
    %100 = vector.extract_strided_slice %7 {offsets = [1, 0, 0], sizes = [1, 10, 16], strides = [1, 1, 1]} : vector<2x10x16xbf16> to vector<1x10x16xbf16>
    %101 = vector.shape_cast %100 : vector<1x10x16xbf16> to vector<10x16xbf16>
    %102 = vector.extract_strided_slice %101 {offsets = [0, 0], sizes = [8, 16], strides = [1, 1]} : vector<10x16xbf16> to vector<8x16xbf16>
    %103 = vector.extract_strided_slice %0 {offsets = [2, 0, 0], sizes = [1, 16, 128], strides = [1, 1, 1]} : vector<3x48x128xbf16> to vector<1x16x128xbf16>
    %104 = vector.shape_cast %103 : vector<1x16x128xbf16> to vector<16x128xbf16>
    %cst_35 = arith.constant dense<0.000000e+00> : vector<8x128xf32>
    %105 = tpu.matmul %102, %104, %cst_35 {dimension_numbers = #tpu.dot_dimension_numbers<[1], [0], [0], [1], [0, 0, 1, 1], [], []>} : vector<8x16xbf16>, vector<16x128xbf16>, vector<8x128xf32> -> vector<8x128xf32>
    %106 = arith.addf %99, %105 : vector<8x128xf32>
    %107 = vector.extract_strided_slice %101 {offsets = [1, 0], sizes = [8, 16], strides = [1, 1]} : vector<10x16xbf16> to vector<8x16xbf16>
    %108 = vector.extract_strided_slice %0 {offsets = [2, 16, 0], sizes = [1, 16, 128], strides = [1, 1, 1]} : vector<3x48x128xbf16> to vector<1x16x128xbf16>
    %109 = vector.shape_cast %108 : vector<1x16x128xbf16> to vector<16x128xbf16>
    %cst_36 = arith.constant dense<0.000000e+00> : vector<8x128xf32>
    %110 = tpu.matmul %107, %109, %cst_36 {dimension_numbers = #tpu.dot_dimension_numbers<[1], [0], [0], [1], [0, 0, 1, 1], [], []>} : vector<8x16xbf16>, vector<16x128xbf16>, vector<8x128xf32> -> vector<8x128xf32>
    %111 = arith.addf %106, %110 : vector<8x128xf32>
    %112 = vector.extract_strided_slice %101 {offsets = [2, 0], sizes = [8, 16], strides = [1, 1]} : vector<10x16xbf16> to vector<8x16xbf16>
    %113 = vector.extract_strided_slice %0 {offsets = [2, 32, 0], sizes = [1, 16, 128], strides = [1, 1, 1]} : vector<3x48x128xbf16> to vector<1x16x128xbf16>
    %114 = vector.shape_cast %113 : vector<1x16x128xbf16> to vector<16x128xbf16>
    %cst_37 = arith.constant dense<0.000000e+00> : vector<8x128xf32>
    %115 = tpu.matmul %112, %114, %cst_37 {dimension_numbers = #tpu.dot_dimension_numbers<[1], [0], [0], [1], [0, 0, 1, 1], [], []>} : vector<8x16xbf16>, vector<16x128xbf16>, vector<8x128xf32> -> vector<8x128xf32>
    %116 = arith.addf %111, %115 : vector<8x128xf32>
    %117 = vector.broadcast %1 : vector<1x128xf32> to vector<8x128xf32>
    %118 = arith.addf %116, %117 : vector<8x128xf32>
    %cst_38 = arith.constant 0.00999999977 : f32
    %119 = vector.broadcast %cst_38 : f32 to vector<8x128xf32>
    %120 = arith.mulf %119, %118 : vector<8x128xf32>
    %121 = arith.maximumf %118, %120 : vector<8x128xf32>
    %122 = arith.truncf %121 : vector<8x128xf32> to vector<8x128xbf16>
    %c1 = arith.constant 1 : index
    %c0_39 = arith.constant 0 : index
    %c0_40 = arith.constant 0 : index
    %c0_41 = arith.constant 0 : index
    %123 = vector.load %arg7[%c1, %c0_39, %c0_40, %c0_41] : memref<2x1x8x128xbf16, #tpu.memory_space<vmem>>, vector<1x1x8x128xbf16>
    %124 = vector.shape_cast %123 : vector<1x1x8x128xbf16> to vector<8x128xbf16>
    %125 = vector.shape_cast %122 : vector<8x128xbf16> to vector<1x1x8x128xbf16>
    tpu.vector_store %arg7[%c1, %c0_39, %c0_40, %c0_41], %125 {strides = array<i32>} : memref<2x1x8x128xbf16, #tpu.memory_space<vmem>>, vector<1x1x8x128xbf16>,
    return
  }
  func.func @transform_0(%arg0: i32, %arg1: i32) -> (i32, i32, i32, i32) {
    %c0_i32 = arith.constant 0 : i32
    %0 = arith.addi %arg1, %c0_i32 : i32
    %c0_i32_0 = arith.constant 0 : i32
    %c0_i32_1 = arith.constant 0 : i32
    %c0_i32_2 = arith.constant 0 : i32
    %c0_i32_3 = arith.constant 0 : i32
    return %c0_i32_0, %0, %c0_i32_1, %c0_i32_2 : i32, i32, i32, i32
  }
  func.func @transform_1(%arg0: i32, %arg1: i32) -> (i32, i32, i32, i32) {
    %c1_i32 = arith.constant 1 : i32
    %0 = arith.addi %arg1, %c1_i32 : i32
    %c0_i32 = arith.constant 0 : i32
    %c0_i32_0 = arith.constant 0 : i32
    %c0_i32_1 = arith.constant 0 : i32
    %c0_i32_2 = arith.constant 0 : i32
    return %c0_i32, %0, %c0_i32_0, %c0_i32_1 : i32, i32, i32, i32
  }
  func.func @transform_2(%arg0: i32, %arg1: i32) -> (i32, i32, i32, i32) {
    %c2_i32 = arith.constant 2 : i32
    %0 = arith.addi %arg1, %c2_i32 : i32
    %c0_i32 = arith.constant 0 : i32
    %c0_i32_0 = arith.constant 0 : i32
    %c0_i32_1 = arith.constant 0 : i32
    %c0_i32_2 = arith.constant 0 : i32
    return %c0_i32, %0, %c0_i32_0, %c0_i32_1 : i32, i32, i32, i32
  }
  func.func @transform_3(%arg0: i32, %arg1: i32) -> (i32, i32, i32) {
    %c0_i32 = arith.constant 0 : i32
    %c0_i32_0 = arith.constant 0 : i32
    %c0_i32_1 = arith.constant 0 : i32
    return %c0_i32, %c0_i32_0, %arg0 : i32, i32, i32
  }
  func.func @transform_4(%arg0: i32, %arg1: i32) -> (i32, i32) {
    %c0_i32 = arith.constant 0 : i32
    %c0_i32_0 = arith.constant 0 : i32
    return %c0_i32, %arg0 : i32, i32
  }
  func.func @transform_5(%arg0: i32, %arg1: i32) -> (i32, i32, i32, i32) {
    %c0_i32 = arith.constant 0 : i32
    %c0_i32_0 = arith.constant 0 : i32
    %c0_i32_1 = arith.constant 0 : i32
    return %c0_i32, %arg1, %c0_i32_0, %arg0 : i32, i32, i32, i32
  }
}

</mosaic_0001>

<bundles_post_ra>
// kernel: tpu_custom_call.1
= control target key start
LH: loop header
LB: loop body
LE: loop exit
PB: predicated region body
PF: predicated region fallthrough
CT: control target
= control target key end

     0   :  { %s2428_s0 = inlined_call_operand.vmem [shape: bf16[2,10,10,16], index: 0, kind: input, shape index: {}]   ;;  %s2429_s1 = inlined_call_operand.vmem [shape: bf16[2,10,10,16], index: 1, kind: input, shape index: {}]   ;;  %s2430_s2 = inlined_call_operand.vmem [shape: bf16[2,10,10,16], index: 2, kind: input, shape index: {}]   ;;  %s2431_s3 = inlined_call_operand.vmem [shape: bf16[3,48,128], index: 3, kind: input, shape index: {}]   ;;  %s2432_s4 = inlined_call_operand.vmem [shape: f32[1,128], index: 4, kind: input, shape index: {}]   ;;  %s2433_s5 = inlined_call_operand.hbm [shape: bf16[2,8,8,128], index: 5, kind: output, shape index: {}]  }
   0x1   :  { %2437 = sst [smem:[#allocation12_spill]] %s2433_s5 }
   0x2   :  { %10 = vsyncpa [#allocation6], 0 }
   0x3   :  { %12 = vsyncpa [#allocation6 + $0x1], 0  ;;  %s2069_s18 = smov 0   ;;  %s2071_s19 = smov 0  }
   0x4   :  { %s2073_s20 = smov 0   ;;  %s2075_s21 = smov 0  }
   0x5   :  { %s2077_s22 = smov 0   ;;  %s2079_s23 = smov 0  }
   0x6   :  { %s2081_s24 = smov 0   ;;  %s2083_s25 = smov 0  }
   0x7   :  { %s2085_s26 = smov 0   ;;  %s2087_s27 = smov 0  }
   0x8 LB: > { %2438 = sst [smem:[#allocation8_spill]] %s2019_s24  ;;  %s1604_s28 = sadd.s32 4294967295, %s2031_s27   ;;  %s2031_s27 = sphi %s2087_s27, %s18_s27   ;;  %s2027_s26 = sphi %s2085_s26, %s2460_s26   ;;  %s2023_s25 = sphi %s2083_s25, %s2459_s25   ;;  %s2019_s24 = sphi %s2081_s24, %s2451_s24   ;;  %s2015_s23 = sphi %s2079_s23, %s2458_s23   ;;  %s2011_s22 = sphi %s2077_s22, %s2457_s22   ;;  %s2007_s21 = sphi %s2075_s21, %s2456_s21   ;;  %s2003_s20 = sphi %s2073_s20, %s2455_s20   ;;  %s1999_s19 = sphi %s2071_s19, %s2454_s19   ;;  %s1995_s18 = sphi %s2069_s18, %s2453_s18  }
   0x9   : > { %2439 = sst [smem:[#allocation9_spill]] %s2023_s25  ;;  %s1605_s29 = sadd.s32 4294967294, %s2031_s27  }
   0xa   : > { %s27_s30 = sadd.s32 1, %s2027_s26  ;;  %s37_s6 = sadd.s32 1, %s2019_s24 }
   0xb   : > { %p28_p0 = scmp.ge.s32.totalorder %s27_s30, 8  ;;  %p44_p1 = scmp.ne.s32.totalorder %s2019_s24, %s2015_s23 }
   0xc   : > { %p45_p2 = scmp.eq.s32.totalorder %s2031_s27, 0  ;;  %s65_s7 = sadd.s32 1, %s2011_s22 }
   0xd   : > { %s2127_s8 = scalar_select %p28_p0, 0, %s27_s30  }
   0xe   : > { %p2134_p3 = por %p45_p2, %p44_p1  ;;  %p72_p4 = scmp.ne.s32.totalorder %s2011_s22, %s2007_s21 }
   0xf   : > { %2440 = sst [smem:[#allocation10_spill]] %s2127_s8  ;;  %s34_s10 = ssub.s32 %s2027_s26, %s2127_s8 }
  0x10   : > { %s61_s11 = sadd.s32 1, %s2127_s8  ;;  %p35_p5 = scmp.eq.s32.totalorder %s34_s10, 0 }
  0x11   : > { %s62_s12 = ssub.s32 %s27_s30, %s61_s11  ;;  %p2145_p7 = por %p72_p4, %p45_p2 }
  0x12   : > { %p63_p6 = scmp.eq.s32.totalorder %s62_s12, 0  ;;  %s88_s16 = sadd.s32 2, %s2027_s26 }
  0x13   : > { %s2150_s14 = scalar_select %p35_p5, %s2019_s24, %s37_s6  }
  0x14   : > { %s2153_s15 = scalar_select %p63_p6, %s2011_s22, %s65_s7  }
  0x15   : > { %2443 = sst [smem:[#allocation11_spill]] %s2150_s14  ;;  %s89_s17 = sadd.s32 2, %s2127_s8 }
  0x16   : > { %s90_s5 = ssub.s32 %s88_s16, %s89_s17  ;;  %s93_s25 = sadd.s32 1, %s2003_s20 }
  0x17   : > { %p91_p8 = scmp.eq.s32.totalorder %s90_s5, 0  ;;  %p100_p9 = scmp.ne.s32.totalorder %s2003_s20, %s1999_s19 }
  0x18   : > { %p184_p10 = scmp.eq.s32.totalorder %s1604_s28, 7  ;;  %p189_p11 = scmp.ne.s32.totalorder %s2015_s23, %s1995_s18 }
  0x19   : > { %s2163_s10 = scalar_select %p91_p8, %s2003_s20, %s93_s25  }
  0x1a   : > { %p2167_p12 = por %p100_p9, %p45_p2  ;;  %p2174_p13 = por %p184_p10, %p44_p1 }
  0x1b   : > { %p190_p0 = scmp.eq.s32.totalorder %s1605_s29, 7  ;;  %p1609_p5 = scmp.ge.s32.totalorder %s2031_s27, 8 }
  0x1d   : > { %p2178_p4 = por %p190_p0, %p189_p11  ;;  %219 = sbr.rel (%p1609_p5) target bundleno = 57 (0x39), region = 24 }
  0x24   : > { %222 = sbr.rel (!%p2134_p3) target bundleno = 43 (0x2b), region = 28  ;;  %s224_s5 = sand.u32 (%p2134_p3), 1, %s2019_s24  }
  0x25   : > { %s1669_s25 = sshll.u32 (%p2134_p3), %s2027_s26, 3  ;;  %s1610_s28 = sshll.u32 (%p2134_p3), %s224_s5, 4 }
  0x26   : > { %s229_s16 = scalar_lea.vmem (%p2134_p3), %s2428_s0, %s1669_s25  ;;  %s226_s29 = scalar_lea.vmem (%p2134_p3), [#allocation2], %s1610_s28 }
  0x27   : > { %v245_v0 = vld [vmem:[%s229_s16] sm:$0xff] (%p2134_p3)   ;;  %v249_v1 = vld [vmem:[%s229_s16 + $0x50] sm:$0xff] (%p2134_p3)  }
  0x28   : > { %246 = vst [vmem:[%s226_s29] sm:$0xff] (%p2134_p3), %v245_v0   ;;  %250 = vst [vmem:[%s226_s29 + $0x8] sm:$0xff] (%p2134_p3), %v249_v1  }
  0x2b PF: > { %283 = sbr.rel (!%p2145_p7) target bundleno = 50 (0x32), region = 69  ;;  %s285_s9 = sand.u32 (%p2145_p7), 1, %s2011_s22  }
  0x2c   : > { %s1614_s17 = sshll.u32 (%p2145_p7), %s2027_s26, 3  ;;  %s1613_s8 = sshll.u32 (%p2145_p7), %s285_s9, 4 }
  0x2d   : > { %s1496_s24 = scalar_lea.vmem (%p2145_p7), %s2429_s1, %s1614_s17  ;;  %s287_s25 = scalar_lea.vmem (%p2145_p7), [#allocation3], %s1613_s8 }
  0x2e   : > { %v1615_v2 = vld [vmem:[%s1496_s24 + $0x8] sm:$0xff] (%p2145_p7)   ;;  %v1617_v3 = vld [vmem:[%s1496_s24 + $0x58] sm:$0xff] (%p2145_p7)  }
  0x2f   : > { %308 = vst [vmem:[%s287_s25] sm:$0xff] (%p2145_p7), %v1615_v2   ;;  %312 = vst [vmem:[%s287_s25 + $0x8] sm:$0xff] (%p2145_p7), %v1617_v3  }
  0x32 PF: > { %345 = sbr.rel (!%p2167_p12) target bundleno = 57 (0x39), region = 110  ;;  %s347_s13 = sand.u32 (%p2167_p12), 1, %s2003_s20  }
  0x33   : > { %s1620_s28 = sshll.u32 (%p2167_p12), %s2027_s26, 3  ;;  %s1619_s11 = sshll.u32 (%p2167_p12), %s347_s13, 4 }
  0x34   : > { %s1501_s29 = scalar_lea.vmem (%p2167_p12), %s2430_s2, %s1620_s28  ;;  %s349_s14 = scalar_lea.vmem (%p2167_p12), [#allocation4], %s1619_s11 }
  0x35   : > { %v1621_v4 = vld [vmem:[%s1501_s29 + $0x10] sm:$0xff] (%p2167_p12)   ;;  %v1623_v5 = vld [vmem:[%s1501_s29 + $0x60] sm:$0xff] (%p2167_p12)  }
  0x36   : > { %370 = vst [vmem:[%s349_s14] sm:$0xff] (%p2167_p12), %v1621_v4   ;;  %374 = vst [vmem:[%s349_s14 + $0x8] sm:$0xff] (%p2167_p12), %v1623_v5  }
  0x39 PF: > { %p1625_p1 = scmp.ge.s32.totalorder %s2031_s27, 1  ;;  %p406_p2 = scmp.lt.s32.totalorder %s2031_s27, 9 }
  0x3b   : > { %p407_p3 = pnand %p1625_p1, %p406_p2 }
  0x3c   : > { %v2209_v6 = vld [vmem:[%s2431_s3 + $0x8] sm:$0xff] (!%p407_p3)   ;;  %v2033_v7 = vmov (!%p407_p3), 0.0   ;;  %v2216_v8 = vld [vmem:[%s2431_s3] sm:$0xff] (!%p407_p3)   ;;  %vm2034_vm0 = vmmov (!%p407_p3), 0   ;;  %s2222_s17 = sand.u32 (!%p407_p3), 1, %s2015_s23   ;;  %vm528_vm1 = vcmask (!%p407_p3), 130048  }
  0x3d   : > { %410 = sbr.rel (%p407_p3) target bundleno = 376 (0x178), region = 151  ;;  %1706 = vmatprep.subr.bf16.mxu0 (!%p407_p3), %v2033_v7  ;;  %1712 = vmatprep.subr.bf16.mxu1 (!%p407_p3), %v2033_v7  ;;  %s1626_s5 = sshll.u32 (!%p407_p3), %s2222_s17, 4  ;;  %v2231_v9 = vld [vmem:[%s2431_s3 + $0x18] sm:$0xff] (!%p407_p3)   ;;  %v1910_v18 = vld [vmem:[%s2431_s3 + $0x10] sm:$0xff] (!%p407_p3)   ;;  %v2256_v20 = vld [vmem:[%s2431_s3 + $0x28] sm:$0xff] (!%p407_p3)  }
  0x3e   : > { %1707 = vmatpush3.bf16.msra.mxu0 (!%p407_p3), %v2209_v6  ;;  %1714 = vmatprep.mubr.msk.bf16.mxu1 (!%p407_p3), %vm2034_vm0, %v2033_v7  ;;  %s420_s28 = sand.u32 (!%p407_p3), 1, %s2007_s21   ;;  %s2236_s11 = scalar_lea.vmem (!%p407_p3), [#allocation2], %s1626_s5  ;;  %v1914_v31 = vld [vmem:[%s2431_s3 + $0x20] sm:$0xff] (!%p407_p3)   ;;  %v2281_v32 = vld [vmem:[%s2431_s3 + $0x38] sm:$0xff] (!%p407_p3)   ;;  %v1916_v41 = vld [vmem:[%s2431_s3 + $0x30] sm:$0xff] (!%p407_p3)  }
  0x3f   : > { %1713 = vmatpush3.bf16.msra.mxu1 (!%p407_p3), %v2216_v8  ;;  %1708 = vmatprep.mubr.msk.bf16.mxu0 (!%p407_p3), %vm2034_vm0, %v2033_v7  ;;  %v498_v10 = vld [vmem:[%s2236_s11] sm:$0xf] (!%p407_p3)  ;;  %v499_v11 = vld [vmem:[%s2236_s11 + $0x4] sm:$0x1] (!%p407_p3)  ;;  %s1627_s12 = sshll.u32 (!%p407_p3), %s420_s28, 4  ;;  %s427_s14 = sand.u32 (!%p407_p3), 1, %s1999_s19  }
  0x40   : > { %1718 = vmatprep.subr.bf16.mxu0 (!%p407_p3), %v2033_v7  ;;  %1724 = vmatprep.subr.bf16.mxu1 (!%p407_p3), %v2033_v7  ;;  %v1630_v12 = vcombine.low (!%p407_p3), %v498_v10, %v499_v11  ;;  %s2245_s21 = scalar_lea.vmem (!%p407_p3), [#allocation3], %s1627_s12  ;;  %s1628_s30 = sshll.u32 (!%p407_p3), %s427_s14, 4  ;;  %v2269_v25 = vld [vmem:[%s2236_s11 + $0x8] sm:$0xf] (!%p407_p3)  ;;  %v501_v26 = vld [vmem:[%s2236_s11 + $0xc] sm:$0x1] (!%p407_p3) }
  0x41   : > { %v502_v15 = vld [vmem:[%s2245_s21] sm:$0xf] (!%p407_p3)  ;;  %v503_v16 = vld [vmem:[%s2245_s21 + $0x4] sm:$0x1] (!%p407_p3)  ;;  %s2260_s9 = scalar_lea.vmem (!%p407_p3), [#allocation4], %s1628_s30  ;;  %v1652_v33 = vcombine.low (!%p407_p3), %v2269_v25, %v501_v26  ;;  %s1629_s14 = sshll.u32 (!%p407_p3), %s2222_s17, 3 }
  0x42   : > { %1715 = vmatmul.mubr.msk.bf16.vlgmr.msra.gmra.mrb[0].mxu1 (!%p407_p3), %vm528_vm1, %v498_v10  ;;  %v516_v13 = vshrl.u32 (!%p407_p3), %v1630_v12, 16  ;;  %v518_v14 = vshll.u32 (!%p407_p3), %v1630_v12, 16  ;;  %v1639_v21 = vcombine.low (!%p407_p3), %v502_v15, %v503_v16  ;;  %v506_v22 = vld [vmem:[%s2260_s9] sm:$0xf] (!%p407_p3)  ;;  %v507_v23 = vld [vmem:[%s2260_s9 + $0x4] sm:$0x1] (!%p407_p3) }
  0x43   : > { %1725 = vmatpush3.bf16.msra.mxu1 (!%p407_p3), %v2231_v9  ;;  %1726 = vmatprep.mubr.msk.bf16.mxu1 (!%p407_p3), %vm2034_vm0, %v2033_v7  ;;  %v1646_v24 = vcombine.low (!%p407_p3), %v506_v22, %v507_v23  ;;  %v621_v27 = vrot.slane (!%p407_p3), %v1630_v12, 1  ;;  %v1017_v40 = vshll.u32 (!%p407_p3), %v1652_v33, 16  ;;  %v1015_v42 = vshrl.u32 (!%p407_p3), %v1652_v33, 16  ;;  %v504_v45 = vld [vmem:[%s2245_s21 + $0x8] sm:$0xf] (!%p407_p3)  ;;  %v1919_v47 = vld [vmem:[%s2431_s3 + $0x40] sm:$0xff] (!%p407_p3)  }
  0x44   : > { %1736 = vmatprep.subr.bf16.mxu1 %v2033_v7  ;;  %v520_v17 = vrot.slane %v518_v14, 1  ;;  %v730_v28 = vshll.u32 %v1639_v21, 16  ;;  %v784_v29 = vrot.slane %v1639_v21, 1  ;;  %v728_v34 = vshrl.u32 %v1639_v21, 16  ;;  %v505_v46 = vld [vmem:[%s2245_s21 + $0xc] sm:$0x1] }
  0x45   : > { %v893_v30 = vshll.u32 %v1646_v24, 16  ;;  %v891_v36 = vshrl.u32 %v1646_v24, 16  ;;  %v1019_v43 = vrot.slane %v1017_v40, 1  ;;  %v1657_v48 = vcombine.low %v504_v45, %v505_v46  ;;  %v508_v55 = vld [vmem:[%s2260_s9 + $0x8] sm:$0xf]  ;;  %s2357_s24 = scalar_lea.vmem [#allocation5], %s1629_s14 }
  0x46   : > { %v521_v19 = vor.u32 %v520_v17, %v516_v13  ;;  %v732_v35 = vrot.slane %v730_v28, 1  ;;  %v947_v49 = vrot.slane %v1646_v24, 1  ;;  %v1107_v50 = vrot.slane %v1652_v33, 1  ;;  %v509_v56 = vld [vmem:[%s2260_s9 + $0xc] sm:$0x1]  ;;  %s2447_s8 = sld [smem:[#allocation9_spill]] }
  0x47   : > { %v895_v37 = vrot.slane %v893_v30, 1  ;;  %v1020_v44 = vor.u32 %v1019_v43, %v1015_v42  ;;  %v1204_v51 = vshll.u32 %v1657_v48, 16  ;;  %v1202_v52 = vshrl.u32 %v1657_v48, 16  ;;  %v1651_v43 = vld [vmem:[%s2432_s4] ss:$0 sm:$0xff]  ;;  %s1462_s30 = sshll.u32 %s2357_s24, 4  ;;  %s2362_s30 = int_to_ptr.vmem [resolvable:$true] %s1462_s30 }
  0x48   : > { %1709 = vmatmul.mubr.msk.bf16.vlgmr.msra.gmra.mrb[0].mxu0 %vm528_vm1, %v521_v19  ;;  %v733_v38 = vor.u32 %v732_v35, %v728_v34  ;;  %v1661_v57 = vcombine.low %v508_v55, %v509_v56  ;;  %v1252_v60 = vrot.slane %v1657_v48, 1  ;;  %s2448_s25 = sld [smem:[#allocation12_spill]]  ;;  %s1449_s11 = scalar_lea.sflag [#allocation6], %s2222_s17 }
  0x49   : > { %1719 = vmatpush3.bf16.msra.mxu0 %v1910_v18  ;;  %1720 = vmatprep.mubr.msk.bf16.mxu0 %vm2034_vm0, %v2033_v7  ;;  %v896_v39 = vor.u32 %v895_v37, %v891_v36  ;;  %v1206_v53 = vrot.slane %v1204_v51, 1  ;;  %s1921_s12 = scalar_lea.vmem %s2362_s30, 128  ;;  %s2035_s16 = smov [#allocation5]  }
  0x4a   : > { %1727 = vmatmul.mubr.msk.bf16.vlgmr.msra.gmra.mrb[4].mxu1 %vm528_vm1, %v502_v15  ;;  %1730 = vmatprep.subr.bf16.mxu0 %v2033_v7  ;;  %v1349_v58 = vshll.u32 %v1661_v57, 16  ;;  %v1397_v59 = vrot.slane %v1661_v57, 1  ;;  %v1347_v61 = vshrl.u32 %v1661_v57, 16  ;;  %p1922_p6 = scmp.ne.s32.totalorder %s2362_s30, %s1921_s12  ;;  %s1925_s21 = sshll.u32 %s2035_s16, 4  ;;  %s1926_s21 = int_to_ptr.vmem [resolvable:$false] %s1925_s21 }
  0x4b   : > { %1737 = vmatpush3.bf16.msra.mxu1 %v2256_v20  ;;  %1738 = vmatprep.mubr.msk.bf16.mxu1 %vm2034_vm0, %v2033_v7  ;;  %v1207_v54 = vor.u32 %v1206_v53, %v1202_v52  ;;  %s1927_s29 = scalar_lea.vmem %s1926_s21, 256  ;;  %p1928_p9 = scmp.lt.s32.totalorder %s2362_s30, %s1926_s21 }
  0x4c   : > { %1748 = vmatprep.subr.bf16.mxu1 %v2033_v7  ;;  %v1351_v62 = vrot.slane %v1349_v58, 1  ;;  %s1666_s9 = sshll.u32 %s2447_s8, 6  ;;  %p1923_p7 = pnand %p1922_p6, %p2174_p13 }
  0x4d   : > { %p1929_p10 = scmp.lt.s32.totalorder %s1927_s29, %s1921_s12 }
  0x4e   : > { %v1352_v63 = vor.u32 %v1351_v62, %v1347_v61  ;;  %s2449_s13 = smov %s2448_s25  ;;  %s2367_s28 = scalar_lea.hbm %s2448_s25, %s1666_s9 }
  0x4f   : > { %p1924_p8 = pneg %p1923_p7  ;;  %p1930_p11 = por %p1929_p10, %p1928_p9 }
  0x50   : > { %1721 = vmatmul.mubr.msk.bf16.vlgmr.msra.gmra.mrb[4].mxu0 %vm528_vm1, %v621_v27 }
  0x51   : > { %1731 = vmatpush3.bf16.msra.mxu0 %v1914_v31  ;;  %1732 = vmatprep.mubr.msk.bf16.mxu0 %vm2034_vm0, %v2033_v7  ;;  %p1931_p12 = pnand %p1930_p11, %p1924_p8 }
  0x52   : > { %1739 = vmatmul.mubr.msk.bf16.vlgmr.msra.gmra.mrb[8].mxu1 %vm528_vm1, %v784_v29  ;;  %1742 = vmatprep.subr.bf16.mxu0 %v2033_v7 }
  0x53   : > { %1749 = vmatpush3.bf16.msra.mxu1 %v2281_v32  ;;  %1750 = vmatprep.mubr.msk.bf16.mxu1 %vm2034_vm0, %v2033_v7 }
  0x54   : > { %1760 = vmatprep.subr.bf16.mxu1 %v2033_v7 }
  0x58   : > { %1733 = vmatmul.mubr.msk.bf16.vlgmr.msra.gmra.mrb[8].mxu0 %vm528_vm1, %v733_v38 }
  0x59   : > { %1743 = vmatpush3.bf16.msra.mxu0 %v1916_v41  ;;  %1744 = vmatprep.mubr.msk.bf16.mxu0 %vm2034_vm0, %v2033_v7 }
  0x5a   : > { %1751 = vmatmul.mubr.msk.bf16.vlgmr.msra.gmra.mrb[12].mxu1 %vm528_vm1, %v896_v39  ;;  %1754 = vmatprep.subr.bf16.mxu0 %v2033_v7 }
  0x5b   : > { %1761 = vmatpush3.bf16.msra.mxu1 %v2209_v6  ;;  %1762 = vmatprep.mubr.msk.bf16.mxu1 %vm2034_vm0, %v2033_v7 }
  0x5c   : > { %1772 = vmatprep.subr.bf16.mxu1 %v2033_v7 }
  0x60   : > { %1745 = vmatmul.mubr.msk.bf16.vlgmr.msra.gmra.mrb[12].mxu0 %vm528_vm1, %v506_v22 }
  0x61   : > { %1755 = vmatpush3.bf16.msra.mxu0 %v1919_v47  ;;  %1756 = vmatprep.mubr.msk.bf16.mxu0 %vm2034_vm0, %v2033_v7 }
  0x62   : > { %1763 = vmatmul.mubr.msk.bf16.vlgmr.msra.gmra.mrb[16].mxu1 %vm528_vm1, %v1020_v44  ;;  %1766 = vmatprep.subr.bf16.mxu0 %v2033_v7 }
  0x63   : > { %1773 = vmatpush3.bf16.msra.mxu1 %v1910_v18  ;;  %1774 = vmatprep.mubr.msk.bf16.mxu1 %vm2034_vm0, %v2033_v7 }
  0x64   : > { %1784 = vmatprep.subr.bf16.mxu1 %v2033_v7 }
  0x68   : > { %1757 = vmatmul.mubr.msk.bf16.vlgmr.msra.gmra.mrb[16].mxu0 %vm528_vm1, %v947_v49 }
  0x69   : > { %1767 = vmatpush3.bf16.msra.mxu0 %v2216_v8  ;;  %1768 = vmatprep.mubr.msk.bf16.mxu0 %vm2034_vm0, %v2033_v7 }
  0x6a   : > { %1775 = vmatmul.mubr.msk.bf16.vlgmr.msra.gmra.mrb[20].mxu1 %vm528_vm1, %v1107_v50  ;;  %1778 = vmatprep.subr.bf16.mxu0 %v2033_v7 }
  0x6b   : > { %1785 = vmatpush3.bf16.msra.mxu1 %v1914_v31  ;;  %1786 = vmatprep.mubr.msk.bf16.mxu1 %vm2034_vm0, %v2033_v7 }
  0x6c   : > { %1796 = vmatprep.subr.bf16.mxu1 %v2033_v7 }
  0x70   : > { %1769 = vmatmul.mubr.msk.bf16.vlgmr.msra.gmra.mrb[20].mxu0 %vm528_vm1, %v2269_v25 }
  0x71   : > { %1779 = vmatpush3.bf16.msra.mxu0 %v2231_v9  ;;  %1780 = vmatprep.mubr.msk.bf16.mxu0 %vm2034_vm0, %v2033_v7 }
  0x72   : > { %1787 = vmatmul.mubr.msk.bf16.vlgmr.msra.gmra.mrb[24].mxu1 %vm528_vm1, %v1207_v54  ;;  %1790 = vmatprep.subr.bf16.mxu0 %v2033_v7 }
  0x73   : > { %1797 = vmatpush3.bf16.msra.mxu1 %v1916_v41  ;;  %1798 = vmatprep.mubr.msk.bf16.mxu1 %vm2034_vm0, %v2033_v7 }
  0x74   : > { %1808 = vmatprep.subr.bf16.mxu1 %v2033_v7 }
  0x78   : > { %1781 = vmatmul.mubr.msk.bf16.vlgmr.msra.gmra.mrb[24].mxu0 %vm528_vm1, %v504_v45 }
  0x79   : > { %1791 = vmatpush3.bf16.msra.mxu0 %v2256_v20  ;;  %1792 = vmatprep.mubr.msk.bf16.mxu0 %vm2034_vm0, %v2033_v7 }
  0x7a   : > { %1799 = vmatmul.mubr.msk.bf16.vlgmr.msra.gmra.mrb[28].mxu1 %vm528_vm1, %v508_v55  ;;  %1802 = vmatprep.subr.bf16.mxu0 %v2033_v7 }
  0x7b   : > { %1809 = vmatpush3.bf16.msra.mxu1 %v1919_v47  ;;  %1810 = vmatprep.mubr.msk.bf16.mxu1 %vm2034_vm0, %v2033_v7 }
  0x80   : > { %1793 = vmatmul.mubr.msk.bf16.vlgmr.msra.gmra.mrb[28].mxu0 %vm528_vm1, %v1252_v60 }
  0x81   : > { %1803 = vmatpush3.bf16.msra.mxu0 %v2281_v32  ;;  %1804 = vmatprep.mubr.msk.bf16.mxu0 %vm2034_vm0, %v2033_v7 }
  0x82   : > { %1811 = vmatmul.mubr.msk.bf16.vlgmr.msra.gmra.mrb[32].mxu1 %vm528_vm1, %v1397_v59 }
  0x88   : > { %1805 = vmatmul.mubr.msk.bf16.vlgmr.msra.gmra.mrb[32].mxu0 %vm528_vm1, %v1352_v63 }
 0x115   : > { %v615_v0 = vpop.f32.mrb[0].mxu1 }
 0x116   : > { %v1716_v1 = vpop.f32.mrb[1].mxu1 }
 0x117   : > { %v618_v2 = vpop.f32.mrb[2].mxu1 }
 0x118   : > { %v1717_v3 = vpop.f32.mrb[3].mxu1 }
 0x11b   : > { %v566_v4 = vpop.f32.mrb[0].mxu0 }
 0x11c   : > { %v616_v6 = vadd.f32 %v615_v0, %v566_v4  ;;  %v1710_v8 = vpop.f32.mrb[1].mxu0 }
 0x11d   : > { %v715_v5 = vpop.f32.mrb[4].mxu1  ;;  %v569_v10 = vpop.f32.mrb[2].mxu0 }
 0x11e   : > { %v1728_v9 = vpop.f32.mrb[5].mxu1  ;;  %v1711_v12 = vpop.f32.mrb[3].mxu0 }
 0x11f   : > { %v718_v11 = vpop.f32.mrb[6].mxu1 }
 0x120   : > { %v1729_v13 = vpop.f32.mrb[7].mxu1 }
 0x123   : > { %v665_v14 = vpop.f32.mrb[4].mxu0 }
 0x124   : > { %v671_v16 = vadd.f32 %v665_v14, %v616_v6  ;;  %v1722_v7 = vpop.f32.mrb[5].mxu0 }
 0x125   : > { %v828_v15 = vpop.f32.mrb[8].mxu1  ;;  %v668_v18 = vpop.f32.mrb[6].mxu0 }
 0x126   : > { %v1740_v17 = vpop.f32.mrb[9].mxu1  ;;  %v1723_v20 = vpop.f32.mrb[7].mxu0  ;;  %v721_v21 = vadd.f32 %v715_v5, %v671_v16 }
 0x127   : > { %v831_v19 = vpop.f32.mrb[10].mxu1 }
 0x128   : > { %v1741_v22 = vpop.f32.mrb[11].mxu1 }
 0x12b   : > { %v777_v23 = vpop.f32.mrb[8].mxu0 }
 0x12c   : > { %v783_v25 = vadd.f32 %v777_v23, %v721_v21  ;;  %v1734_v26 = vpop.f32.mrb[9].mxu0 }
 0x12d   : > { %v940_v24 = vpop.f32.mrb[12].mxu1  ;;  %v780_v28 = vpop.f32.mrb[10].mxu0 }
 0x12e   : > { %v1752_v27 = vpop.f32.mrb[13].mxu1  ;;  %v1735_v30 = vpop.f32.mrb[11].mxu0  ;;  %v834_v31 = vadd.f32 %v828_v15, %v783_v25 }
 0x12f   : > { %v943_v29 = vpop.f32.mrb[14].mxu1 }
 0x130   : > { %v1753_v32 = vpop.f32.mrb[15].mxu1 }
 0x133   : > { %v878_v33 = vpop.f32.mrb[12].mxu0 }
 0x134   : > { %v884_v35 = vadd.f32 %v878_v33, %v834_v31  ;;  %v1746_v36 = vpop.f32.mrb[13].mxu0 }
 0x135   : > { %v1058_v34 = vpop.f32.mrb[16].mxu1  ;;  %v881_v38 = vpop.f32.mrb[14].mxu0 }
 0x136   : > { %v1764_v37 = vpop.f32.mrb[17].mxu1  ;;  %v1747_v40 = vpop.f32.mrb[15].mxu0  ;;  %v946_v41 = vadd.f32 %v940_v24, %v884_v35 }
 0x137   : > { %v1061_v39 = vpop.f32.mrb[18].mxu1 }
 0x138   : > { %v1765_v42 = vpop.f32.mrb[19].mxu1 }
 0x13b   : > { %v991_v44 = vpop.f32.mrb[16].mxu0 }
 0x13c   : > { %v997_v46 = vadd.f32 %v991_v44, %v946_v41  ;;  %v1758_v47 = vpop.f32.mrb[17].mxu0 }
 0x13d   : > { %v1145_v45 = vpop.f32.mrb[20].mxu1  ;;  %v994_v49 = vpop.f32.mrb[18].mxu0 }
 0x13e   : > { %v1776_v48 = vpop.f32.mrb[21].mxu1  ;;  %v1004_v51 = vadd.f32 %v1651_v43, %v997_v46  ;;  %v1759_v52 = vpop.f32.mrb[19].mxu0 }
 0x13f   : > { %v1148_v50 = vpop.f32.mrb[22].mxu1 }
 0x140   : > { %v1777_v53 = vpop.f32.mrb[23].mxu1  ;;  %v1005_v54 = vmul.f32 0.01, %v1004_v51 }
 0x142   : > { %v1006_v55 = vmax.f32 %v1004_v51, %v1005_v54 }
 0x143   : > { %v1101_v56 = vpop.f32.mrb[20].mxu0 }
 0x144   : > { %v1007_v58 = vpack.c.bf16 %v1006_v55, %v1006_v55  ;;  %v1102_v59 = vadd.f32 %v1101_v56, %v1058_v34  ;;  %v1770_v60 = vpop.f32.mrb[21].mxu0 }
 0x145   : > { %v1245_v57 = vpop.f32.mrb[24].mxu1  ;;  %v1104_v62 = vpop.f32.mrb[22].mxu0 }
 0x146   : > { %v1788_v61 = vpop.f32.mrb[25].mxu1  ;;  %1008 = vst [vmem:[%s2357_s24] sm:$0xf] %v1007_v58  ;;  %v1771_v0 = vpop.f32.mrb[23].mxu0  ;;  %v1151_v1 = vadd.f32 %v1145_v45, %v1102_v59 }
 0x147   : > { %v1248_v63 = vpop.f32.mrb[26].mxu1 }
 0x148   : > { %v1789_v2 = vpop.f32.mrb[27].mxu1 }
 0x14b   : > { %v1189_v3 = vpop.f32.mrb[24].mxu0 }
 0x14c   : > { %v1195_v5 = vadd.f32 %v1189_v3, %v1151_v1  ;;  %v1782_v6 = vpop.f32.mrb[25].mxu0 }
 0x14d   : > { %v1334_v4 = vpop.f32.mrb[28].mxu1  ;;  %v1192_v9 = vpop.f32.mrb[26].mxu0 }
 0x14e   : > { %v1800_v8 = vpop.f32.mrb[29].mxu1  ;;  %v1783_v11 = vpop.f32.mrb[27].mxu0  ;;  %v1251_v12 = vadd.f32 %v1245_v57, %v1195_v5 }
 0x14f   : > { %v1337_v10 = vpop.f32.mrb[30].mxu1 }
 0x150   : > { %v1801_v13 = vpop.f32.mrb[31].mxu1 }
 0x153   : > { %v1290_v14 = vpop.f32.mrb[28].mxu0 }
 0x154   : > { %v1296_v16 = vadd.f32 %v1290_v14, %v1251_v12  ;;  %v1794_v7 = vpop.f32.mrb[29].mxu0 }
 0x155   : > { %v1435_v15 = vpop.f32.mrb[32].mxu1  ;;  %v1293_v18 = vpop.f32.mrb[30].mxu0 }
 0x156   : > { %v1812_v17 = vpop.f32.mrb[33].mxu1  ;;  %v1795_v20 = vpop.f32.mrb[31].mxu0  ;;  %v1340_v21 = vadd.f32 %v1334_v4, %v1296_v16 }
 0x157   : > { %v1438_v19 = vpop.f32.mrb[34].mxu1 }
 0x158   : > { %v1813_v22 = vpop.f32.mrb[35].mxu1 }
 0x15b   : > { %v1390_v23 = vpop.f32.mrb[32].mxu0 }
 0x15c   : > { %v1396_v24 = vadd.f32 %v1390_v23, %v1340_v21  ;;  %v1806_v25 = vpop.f32.mrb[33].mxu0 }
 0x15d   : > { %v1393_v26 = vpop.f32.mrb[34].mxu0 }
 0x15e   : > { %v1441_v27 = vadd.f32 %v1435_v15, %v1396_v24  ;;  %v1807_v28 = vpop.f32.mrb[35].mxu0 }
 0x160   : > { %v1442_v29 = vadd.f32 %v1651_v43, %v1441_v27 }
 0x162   : > { %v1443_v30 = vmul.f32 0.01, %v1442_v29 }
 0x164   : > { %v1444_v31 = vmax.f32 %v1442_v29, %v1443_v30 }
 0x166   : > { %v1445_v32 = vpack.c.bf16 %v1444_v31, %v1444_v31 }
 0x168   : > { %1664 = vst [vmem:[%s2357_s24 + $0x4] sm:$0xf] %v1445_v32 }
 0x169   : > { %1934 = shalt.err (!%p1931_p12)
}
 0x16a   : > { %s1935_s14 = scalar_lea.hbm %s2367_s28, 128  ;;  %s1939_s9 = scalar_lea.hbm %s2449_s13, 1024 }
 0x16b   : > { %p1936_p0 = scmp.ne.s32.totalorder %s2367_s28, %s1935_s14  ;;  %p1940_p2 = scmp.lt.u32.totalorder %s2367_s28, %s2449_s13 }
 0x16c   : > { %p1941_p3 = scmp.lt.u32.totalorder %s1939_s9, %s1935_s14  ;;  %p1943_p7 = scmp.lt.u32.totalorder %s1935_s14, %s2367_s28 }
 0x16d   : > { %p1937_p5 = pnand %p1936_p0, %p2174_p13 }
 0x16e   : > { %p1942_p6 = por %p1941_p3, %p1940_p2 }
 0x16f   : > { %p1938_p1 = pneg %p1937_p5 }
 0x170   : > { %p1944_p8 = por %p1943_p7, %p1942_p6 }
 0x172   : > { %p1945_p9 = pnand %p1944_p8, %p1938_p1 }
 0x174   : > { %1948 = shalt.err (!%p1945_p9)
}
 0x175   : > { %s2036_s25 = smov 64   ;;  %s2037_s12 = smov 512  }
 0x176   : > { %s2038_s16 = smov 4  }
 0x177   : > { %1814 = dma.vmem_to_hbm [thread:$0]  (%p2174_p13), %s2362_s30, 128, %s2367_s28, %s1449_s11, %s2036_s25, %s2037_s12, %s2038_s16  }
 0x178 PF: > { %p1820_p10 = scmp.ge.s32.totalorder %s2031_s27, 2  ;;  %s1477_s21 = sand.u32 1, %s1995_s18  }
 0x179   : > { %s1478_s29 = scalar_lea.sflag [#allocation6], %s1477_s21 }
 0x17a   : > { %p1817_p11 = pnand %p1820_p10, %p2178_p4 }
 0x17c   : > { %1990 = dma.done.wait (!%p1817_p11), %s1478_s29, 128  }
 0x17d   : > { %1992 = vsyncadd (!%p1817_p11), %s1478_s29, 4294967168  ;;  %s18_s27 = sadd.s32 1, %s2031_s27   ;;  %s2450_s6 = sld [smem:[#allocation8_spill]] }
 0x17e   : > { %p15_p12 = scmp.ge.s32.totalorder %s18_s27, 10   ;;  %s2451_s24 = sld [smem:[#allocation11_spill]] }
 0x17f   : > { %s2452_s17 = sld [smem:[#allocation10_spill]]  ;;  %s2453_s18 = smov %s2015_s23 }
 0x180   : > { %s2454_s19 = smov %s2003_s20  ;;  %s2455_s20 = smov %s2163_s10 }
 0x181   : > { %s2456_s21 = smov %s2011_s22  ;;  %s2457_s22 = smov %s2153_s15 }
 0x182   : > { %s2459_s25 = smov %s2027_s26  ;;  %17 = sbr.rel (!%p15_p12) target bundleno = 8 (0x8), region = 226 }
 0x183   : > { %s2458_s23 = smov %s2450_s6 }
 0x185   : > { %s2460_s26 = smov %s2452_s17 }
 0x189   :  { %1483 = vsyncpa [#allocation6], 1 }
 0x18a   :  { %1485 = vsyncpa [#allocation6 + $0x1], 1 }

</bundles_post_ra>
